<compile_context>
chip_gen: v6e
topology: v6e:2x2x1
jax: 0.10.0
libtpu: 0.0.40
codegen_flags: <defaults>
</compile_context>

<pallas_src>
import functools
import inspect

import jax
import jax.numpy as jnp
from jax.experimental import pallas as pl
from jax.experimental.pallas import tpu as pltpu

_MIB = 1024 * 1024


def _round_up(x, m):
    return ((x + m - 1) // m) * m


# ----------------------------- kernel body ----------------------------------


def _decoder_kernel(x_ref, w_ref, b_ref, o_ref):
    # x_ref: (M_pad, K)   resident activations (same block every grid step)
    # w_ref: (K, tn)      streamed weight tile, lane-dense (tn multiple of 128)
    # b_ref: (1, tn)      bias tile
    # o_ref: (M_pad, tn)  lane-dense output tile
    acc = jnp.dot(x_ref[...], w_ref[...], preferred_element_type=jnp.float32)
    o_ref[...] = (acc + b_ref[...].astype(jnp.float32)).astype(o_ref.dtype)


# ------------------------- one-time parameter prep --------------------------


def prepare_decoder_params(weight, bias, *, weight_dtype=None):
    """One-time prep (call OUTSIDE jit): optional narrow cast + transpose.

    weight: (ntoken, ninp) as in nn.Linear; bias: (ntoken,).
    Returns (w_kn, bias2d) with w_kn of shape (ninp, ntoken) so the kernel
    streams lane-dense (K, tn) tiles with a canonical dot.  Hoisting the cast
    here (instead of inside the jitted forward) is what actually realizes the
    ~2x streamed-byte saving of bf16 weights.
    """
    if weight_dtype is not None:
        weight = weight.astype(weight_dtype)
    w_kn = jnp.transpose(weight)          # (ninp, ntoken)
    b2d = bias.reshape(1, -1)
    return w_kn, b2d


# ----------------------------- tiling heuristics -----------------------------


def _vmem_capacity_bytes():
    try:
        info = pltpu.get_tpu_info()
        cap = getattr(info, "vmem_capacity_bytes", None)
        if cap:
            return int(cap)
    except Exception:
        pass
    return 64 * _MIB  # conservative fallback (v7x per-TC VMEM)


def _pick_tn(M_pad, K, N, w_bytes, x_bytes, out_bytes, budget_bytes, n_w_bufs=2):
    """Largest multiple-of-128 vocab tile whose *padded* VMEM working set fits."""
    N_pad = _round_up(N, 128)
    # Layout-aware padding: lane dim rounds to 128; sublane dim to 8 (f32),
    # 16 (bf16), 32 (int8/fp8).
    sub_w = max(8, 32 // max(w_bytes, 1))
    sub_x = max(8, 32 // max(x_bytes, 1))
    x_resident = 2 * _round_up(M_pad, sub_x) * _round_up(K, 128) * x_bytes
    for tn in (16384, 8192, 4096, 2048, 1024, 512, 256, 128):
        if tn > N_pad:
            continue
        need = (n_w_bufs * _round_up(K, sub_w) * tn * w_bytes   # weight buffers
                + 2 * _round_up(M_pad, 8) * tn * out_bytes      # output buffers
                + 2 * 8 * tn * 4                                # bias buffers
                + x_resident)                                   # resident x
        if need <= budget_bytes:
            return tn
    return 128


def _cap_tn_for_grid(tn, N):
    """Keep the grid >= 2 steps when possible so both v7x TensorCores engage
    and the double buffer actually overlaps; costs at most one extra ~0.35us
    step on single-core parts."""
    N_pad = _round_up(N, 128)
    max_split = (N_pad // 2 // 128) * 128
    if max_split >= 128:
        tn = min(tn, max_split)
    return tn


# --------------------------------- forward ----------------------------------


def decoder_forward(inp, w_kn, bias2d, *, tn=None, out_dtype=None,
                    weight_buffers=2, interpret=False):
    """Forward of `Decoder`: Linear(ninp -> ntoken) then permute(1, 0, 2).

    inp:    (S, B, ninp)
    w_kn:   (ninp, ntoken)  pre-transposed (and optionally pre-cast) weight
    bias2d: (1, ntoken)
    returns (B, S, ntoken)
    """
    S, B, K = inp.shape
    Kw, N = w_kn.shape
    assert Kw == K, (Kw, K)
    M = B * S
    out_dtype = inp.dtype if out_dtype is None else out_dtype

    # b-major reorder of the tiny activations (O(M*K)) -> flattened output row
    # order is (b, s), so the final reshape to (B, S, N) is free: no big-output
    # transpose anywhere.
    x2d = jnp.transpose(inp, (1, 0, 2)).reshape(M, K)

    # Pad M to the sublane multiple so output stores are unmasked vst's.
    sub = max(8, 32 // max(x2d.dtype.itemsize, 1))
    M_pad = _round_up(M, sub)
    if M_pad != M:
        x2d = jnp.pad(x2d, ((0, M_pad - M), (0, 0)))

    # Generation-aware VMEM budget / scoped limit.
    cap = _vmem_capacity_bytes()
    if cap >= 100 * _MIB:               # v5e / v6e: 128 MiB VMEM
        budget, vmem_limit = 72 * _MIB, 96 * _MIB
    else:                               # v7x: 64 MiB per-TC VMEM
        budget, vmem_limit = 26 * _MIB, 48 * _MIB

    if tn is None:
        tn = _pick_tn(M_pad, K, N, w_kn.dtype.itemsize, x2d.dtype.itemsize,
                      jnp.dtype(out_dtype).itemsize, budget,
                      n_w_bufs=max(2, weight_buffers))
        tn = _cap_tn_for_grid(tn, N)
    grid = (pl.cdiv(N, tn),)

    # Optional deeper pipelining on the streamed weight (sweepable; default 2).
    w_spec_kwargs = {}
    if (weight_buffers != 2
            and "pipeline_mode" in inspect.signature(pl.BlockSpec).parameters):
        w_spec_kwargs["pipeline_mode"] = pl.Buffered(weight_buffers)

    out2d = pl.pallas_call(
        _decoder_kernel,
        out_shape=jax.ShapeDtypeStruct((M_pad, N), out_dtype),
        grid_spec=pltpu.PrefetchScalarGridSpec(
            num_scalar_prefetch=0,
            grid=grid,
            in_specs=[
                pl.BlockSpec((M_pad, K), lambda j: (0, 0)),            # resident x
                pl.BlockSpec((K, tn), lambda j: (0, j), **w_spec_kwargs),  # weight
                pl.BlockSpec((1, tn), lambda j: (0, j)),               # bias
            ],
            out_specs=pl.BlockSpec((M_pad, tn), lambda j: (0, j)),
        ),
        compiler_params=pltpu.CompilerParams(
            dimension_semantics=("parallel",),        # shards over v7x's 2 TCs
            vmem_limit_bytes=vmem_limit),
        interpret=interpret,
    )(x2d, w_kn, bias2d)

    return out2d[:M].reshape(B, S, N)
    # TODO(synk): if S*B ever grows large, also tile M (tm=128/256, "parallel").


def _reference(inp, weight, bias):
    # Plain-JAX reference of the PyTorch forward: Linear then permute(1, 0, 2).
    # `weight` is in the original (ntoken, ninp) nn.Linear layout.
    return jnp.transpose(jnp.einsum("sbk,nk->sbn", inp, weight) + bias, (1, 0, 2))


if __name__ == "__main__":
    key = jax.random.PRNGKey(0)
    k_in, k_w, k_in2, k_w2, k_in3, k_w3, k_b3 = jax.random.split(key, 7)
    initrange = 0.1

    # --- 1) Small shapes, exact f32 path (matches Decoder.init_weights). ---
    S, B, ninp, ntoken = 8, 2, 32, 128
    inp = jax.random.normal(k_in, (S, B, ninp), dtype=jnp.float32)
    weight = jax.random.uniform(k_w, (ntoken, ninp), minval=-initrange,
                                maxval=initrange, dtype=jnp.float32)
    bias = jnp.zeros((ntoken,), dtype=jnp.float32)

    w_kn, b2d = prepare_decoder_params(weight, bias)        # one-time, outside jit
    fwd = jax.jit(decoder_forward)
    out = jax.block_until_ready(fwd(inp, w_kn, b2d))
    ref = _reference(inp, weight, bias)
    assert out.shape == (B, S, ntoken), out.shape
    assert jnp.allclose(out, ref, atol=1e-5, rtol=1e-5)

    # --- 2) Larger vocab with bf16 weight streaming (cast hoisted out of jit)
    #        and an explicit small tile so the weight streams over 4 steps. ---
    ntoken2 = 1024
    inp2 = jax.random.normal(k_in2, (S, B, ninp), dtype=jnp.float32)
    weight2 = jax.random.uniform(k_w2, (ntoken2, ninp), minval=-initrange,
                                 maxval=initrange, dtype=jnp.float32)
    bias2 = jnp.zeros((ntoken2,), dtype=jnp.float32)

    w_kn2, b2d2 = prepare_decoder_params(weight2, bias2, weight_dtype=jnp.bfloat16)
    fwd2 = jax.jit(functools.partial(decoder_forward, tn=256))
    out2 = jax.block_until_ready(fwd2(inp2, w_kn2, b2d2))
    # Reference uses the same bf16-rounded weights so only the kernel is tested.
    ref2 = _reference(inp2, weight2.astype(jnp.bfloat16).astype(jnp.float32), bias2)
    assert out2.shape == (B, S, ntoken2), out2.shape
    assert jnp.allclose(out2, ref2, atol=2e-2, rtol=2e-2)

    # --- 3) Awkward shapes: M not a sublane multiple, K not a multiple of 128,
    #        non-zero bias, automatic tile selection (exercises padding). ---
    S3, B3, ninp3, ntoken3 = 3, 2, 48, 384
    inp3 = jax.random.normal(k_in3, (S3, B3, ninp3), dtype=jnp.float32)
    weight3 = jax.random.uniform(k_w3, (ntoken3, ninp3), minval=-initrange,
                                 maxval=initrange, dtype=jnp.float32)
    bias3 = jax.random.normal(k_b3, (ntoken3,), dtype=jnp.float32) * 0.01

    w_kn3, b2d3 = prepare_decoder_params(weight3, bias3)
    out3 = jax.block_until_ready(jax.jit(decoder_forward)(inp3, w_kn3, b2d3))
    ref3 = _reference(inp3, weight3, bias3)
    assert out3.shape == (B3, S3, ntoken3), out3.shape
    assert jnp.allclose(out3, ref3, atol=1e-5, rtol=1e-5)

    print("KERNEL_OK")
</pallas_src>

<mosaic_0001>
module attributes {stable_mosaic.version = 11 : i64} {
  func.func @_decoder_kernel(%arg0: i32, %arg1: memref<16x32xf32, #tpu.memory_space<vmem>>, %arg2: memref<32x128xf32, #tpu.memory_space<vmem>>, %arg3: memref<1x128xf32, #tpu.memory_space<vmem>>, %arg4: memref<16x128xf32, #tpu.memory_space<vmem>>) attributes {dimension_semantics = [#tpu.dimension_semantics<parallel>], iteration_bounds = array<i64: 1>, scalar_prefetch = 0 : i64, scratch_operands = 0 : i64, tpu.core_type = #tpu.core_type<tc>, window_params = [{pipeline_mode = #tpu.pipeline_mode<synchronous>, transform_indices = @transform_0, window_bounds = array<i64: 16, 32>}, {transform_indices = @transform_1, window_bounds = array<i64: 32, 128>}, {transform_indices = @transform_2, window_bounds = array<i64: 1, 128>}, {transform_indices = @transform_3, window_bounds = array<i64: 16, 128>}]} {
    %c0 = arith.constant 0 : index
    %c0_0 = arith.constant 0 : index
    %0 = vector.load %arg1[%c0, %c0_0] : memref<16x32xf32, #tpu.memory_space<vmem>>, vector<16x32xf32>
    %c0_1 = arith.constant 0 : index
    %c0_2 = arith.constant 0 : index
    %1 = vector.load %arg2[%c0_1, %c0_2] : memref<32x128xf32, #tpu.memory_space<vmem>>, vector<32x128xf32>
    %cst = arith.constant dense<0.000000e+00> : vector<16x128xf32>
    %2 = tpu.matmul %0, %1, %cst {dimension_numbers = #tpu.dot_dimension_numbers<[1], [0], [0], [1], [0, 0, 1, 1], [], []>} : vector<16x32xf32>, vector<32x128xf32>, vector<16x128xf32> -> vector<16x128xf32>
    %c0_3 = arith.constant 0 : index
    %c0_4 = arith.constant 0 : index
    %3 = vector.load %arg3[%c0_3, %c0_4] : memref<1x128xf32, #tpu.memory_space<vmem>>, vector<1x128xf32>
    %4 = vector.broadcast %3 : vector<1x128xf32> to vector<16x128xf32>
    %5 = arith.addf %2, %4 : vector<16x128xf32>
    %c0_5 = arith.constant 0 : index
    %c0_6 = arith.constant 0 : index
    %6 = vector.load %arg4[%c0_5, %c0_6] : memref<16x128xf32, #tpu.memory_space<vmem>>, vector<16x128xf32>
    tpu.vector_store %arg4[%c0_5, %c0_6], %5 {strides = array<i32>} : memref<16x128xf32, #tpu.memory_space<vmem>>, vector<16x128xf32>,
    return
  }
  func.func @transform_0(%arg0: i32) -> (i32, i32) {
    %c0_i32 = arith.constant 0 : i32
    %c0_i32_0 = arith.constant 0 : i32
    %c0_i32_1 = arith.constant 0 : i32
    return %c0_i32, %c0_i32_0 : i32, i32
  }
  func.func @transform_1(%arg0: i32) -> (i32, i32) {
    %c0_i32 = arith.constant 0 : i32
    %c0_i32_0 = arith.constant 0 : i32
    return %c0_i32, %arg0 : i32, i32
  }
  func.func @transform_2(%arg0: i32) -> (i32, i32) {
    %c0_i32 = arith.constant 0 : i32
    %c0_i32_0 = arith.constant 0 : i32
    return %c0_i32, %arg0 : i32, i32
  }
  func.func @transform_3(%arg0: i32) -> (i32, i32) {
    %c0_i32 = arith.constant 0 : i32
    %c0_i32_0 = arith.constant 0 : i32
    return %c0_i32, %arg0 : i32, i32
  }
}

</mosaic_0001>

<bundles_post_ra>
// kernel: decoder_forward.1
= control target key start
LH: loop header
LB: loop body
LE: loop exit
PB: predicated region body
PF: predicated region fallthrough
CT: control target
= control target key end

     0   :  { %vm28_vm0 = vcmask 261120   ;;  %s220_s0 = inlined_call_operand.vmem [shape: f32[16,32], index: 0, kind: input, shape index: {}]   ;;  %s221_s1 = inlined_call_operand.vmem [shape: f32[32,128], index: 1, kind: input, shape index: {}]   ;;  %s222_s2 = inlined_call_operand.vmem [shape: f32[1,128], index: 2, kind: input, shape index: {}]   ;;  %s223_s3 = inlined_call_operand.hbm [shape: f32[16,128], index: 3, kind: output, shape index: {}]  }
   0x1   :  { %v20_v0 = vld [vmem:[%s221_s1 + $0x18] sm:$0xff]  ;;  %v19_v1 = vld [vmem:[%s221_s1 + $0x10] sm:$0xff]  ;;  %v15_v2 = vld [vmem:[%s220_s0] sm:$0xff] }
   0x2   :  { %137 = vmatprep.subr.mxu0 %v20_v0  ;;  %v18_v3 = vld [vmem:[%s221_s1 + $0x8] sm:$0xff]  ;;  %145 = vmatprep.mubr.msk.f32.mxu0 %vm28_vm0, %v15_v2 }
   0x3   :  { %138 = vmatpush3.msra.mxu0 %v20_v0 }
   0x4   :  { %8 = vsyncpa [#allocation3], 0  ;;  %139 = vmatprep.subr.mxu0 %v19_v1  ;;  %v17_v4 = vld [vmem:[%s221_s1] sm:$0xff]  ;;  %v16_v5 = vld [vmem:[%s220_s0 + $0x8] sm:$0xff]  ;;  %s173_s26 = smov [#allocation2]  }
   0x5   :  { %140 = vmatpush3.msra.mxu0 %v19_v1  ;;  %v128_v6 = vld [vmem:[%s222_s2] ss:$0 sm:$0xff]  ;;  %s117_s27 = sshll.u32 %s173_s26, 4  ;;  %s118_s27 = int_to_ptr.vmem [resolvable:$true] %s117_s27 }
   0x6   :  { %141 = vmatprep.subr.mxu0 %v18_v3  ;;  %s151_s1 = scalar_lea.vmem %s118_s27, 256  ;;  %p156_p1 = scmp.lt.s32.totalorder %s118_s27, %s118_s27 }
   0x7   :  { %142 = vmatpush3.msra.mxu0 %v18_v3  ;;  %p152_p0 = scmp.ne.s32.totalorder %s118_s27, %s151_s1  ;;  %p157_p2 = scmp.lt.s32.totalorder %s151_s1, %s151_s1 }
   0x8   :  { %143 = vmatprep.subr.mxu0 %v17_v4 }
   0x9   :  { %144 = vmatpush3.msra.mxu0 %v17_v4  ;;  %p158_p3 = por %p157_p2, %p156_p1 }
   0xa   :  { %146 = vmatmul.mubr.msk.f32.vlgmr.msra.gmra.mxu0 %vm28_vm0, %v16_v5 }
   0xb   :  { %p159_p4 = pnand %p158_p3, %p152_p0 }
  0xca   :  { %v147_v7 = vpop.f32.mrf.mxu0 }
  0xcb   :  { %v107_v8 = vadd.f32 %v147_v7, %v128_v6 }
  0xcc   :  { %v101_v9 = vpop.f32.mrf.mxu0 }
  0xcd   :  { %111 = vst [vmem:[#allocation2 + $0x8] sm:$0xff] %v107_v8  ;;  %v102_v10 = vadd.f32 %v128_v6, %v101_v9 }
  0xcf   :  { %110 = vst [vmem:[#allocation2] sm:$0xff] %v102_v10 }
  0xd0   :  { %162 = shalt.err (!%p159_p4)
}
  0xd1   :  { %s174_s0 = smov 128   ;;  %s175_s28 = smov 8  }
  0xd2   :  { %123 = dma.vmem_to_hbm [thread:$0]  %s118_s27, 256, %s223_s3, [#allocation3], %s174_s0, %s174_s0, %s175_s28  }
  0xd3   :  { %171 = dma.done.wait [#allocation3], 256  }
  0xd4   :  { %172 = vsyncadd [#allocation3], 4294967040 }
  0xd5   :  { %127 = vsyncpa [#allocation3], 1 }

</bundles_post_ra>
